<compile_context>
chip_gen: v7x
topology: tpu7x:2x2x1
jax: 0.10.0
libtpu: 0.0.40
codegen_flags: <defaults>
</compile_context>

<pallas_src>
import functools

import jax
import jax.numpy as jnp
from jax.experimental import pallas as pl
from jax.experimental.pallas import tpu as pltpu

_CH_ALIGN = 16  # sublane alignment for bf16 tiles


def _elu(x):
    # PyTorch nn.ELU(alpha=1.0); clamp the exp argument so the unselected
    # branch never produces inf.
    return jnp.where(x > 0, x, jnp.exp(jnp.minimum(x, 0.0)) - 1.0)


def _temporal_block_kernel(has_ds, K, dilation, pad, L_true, T, *refs):
    """Fused TemporalBlock on one (batch, L-tile) grid step.

    Layout is (channels, time): time sits on the 128-lane axis.

    Refs:
      x_ref    : (Cin_p,  L_ext)      bf16   full padded row (resident per batch)
      w1_ref   : (Cout_p, K*Cin_p)    bf16   im2col-packed conv1 weight
      b1_ref   : (Cout_p, 1)          f32
      w2_ref   : (Cout_p, K*Cout_p)   bf16
      b2_ref   : (Cout_p, 1)          f32
      [wd_ref  : (Cout_p, Cin_p) bf16, bd_ref: (Cout_p, 1) f32]  (downsample)
      o_ref    : (Cout_p, T)          bf16
      win1_ref : (K*Cin_p,  T + 2*pad) bf16  VMEM im2col scratch (conv1)
      win2_ref : (K*Cout_p, T)         bf16  VMEM im2col scratch (conv2)
    """
    if has_ds:
        (x_ref, w1_ref, b1_ref, w2_ref, b2_ref, wd_ref, bd_ref,
         o_ref, win1_ref, win2_ref) = refs
    else:
        (x_ref, w1_ref, b1_ref, w2_ref, b2_ref,
         o_ref, win1_ref, win2_ref) = refs

    cin_p = x_ref.shape[0]
    cout_p = o_ref.shape[0]
    w1_len = T + 2 * pad                      # width of the halo'd h1 tile
    wx = T + 4 * pad                          # width of the halo'd x tile

    # Dynamic, lane-aligned slice of the resident padded row: the halo is
    # recomputed per tile instead of being re-DMA'd from HBM.
    start = pl.program_id(1) * T
    if T % 128 == 0:
        start = pl.multiple_of(start, 128)
    xb = x_ref[:, pl.ds(start, wx)]           # (cin_p, T + 4*pad) bf16

    # ---- conv1: im2col window + single wide-contraction MXU matmul ----
    for k in range(K):                        # K static -> unrolled stores
        win1_ref[pl.ds(k * cin_p, cin_p), :] = (
            xb[:, k * dilation:k * dilation + w1_len])
    acc1 = jnp.dot(w1_ref[...], win1_ref[...],
                   preferred_element_type=jnp.float32)
    h1 = _elu(acc1 + b1_ref[...])             # (cout_p, T + 2*pad) f32

    # positions outside the true sequence act as conv2's zero padding
    col = jax.lax.broadcasted_iota(jnp.int32, (cout_p, w1_len), 1)
    gpos = pl.program_id(1) * T - pad + col   # global time index of each column
    h1 = jnp.where((gpos >= 0) & (gpos < L_true), h1, 0.0).astype(xb.dtype)

    # ---- conv2: im2col window + single MXU matmul ----
    for k in range(K):
        win2_ref[pl.ds(k * cout_p, cout_p), :] = (
            h1[:, k * dilation:k * dilation + T])
    acc2 = jnp.dot(w2_ref[...], win2_ref[...],
                   preferred_element_type=jnp.float32)
    h2 = _elu(acc2 + b2_ref[...])             # (cout_p, T) f32

    # ---- residual path ----
    x_res = xb[:, 2 * pad:2 * pad + T]        # x at the tile's output positions
    if has_ds:
        res = jnp.dot(wd_ref[...], x_res,
                      preferred_element_type=jnp.float32) + bd_ref[...]
    else:
        res = x_res.astype(jnp.float32)       # Cin_p == Cout_p here

    o_ref[...] = _elu(h2 + res).astype(o_ref.dtype)


def temporal_block_forward(x_pcl, w1m, b1, w2m, b2, wdm, bd,
                           dilation, K, tile_l):
    """One TemporalBlock.  x_pcl: (N, Cin_p, L) bf16 (channel-padded)."""
    N, cin_p, L = x_pcl.shape
    cout_p = w1m.shape[0]
    pad = (K - 1) // 2 * dilation
    has_ds = wdm is not None

    if L <= tile_l:
        T, nt = L, 1
    else:
        assert tile_l % 128 == 0, "tile_l must be a multiple of 128"
        T, nt = tile_l, -(-L // tile_l)
    L_round = nt * T
    L_ext = L_round + 4 * pad                 # padded row width

    # Single zero-extended copy of x (2*pad each side + round-up tail); tiles
    # take their halo by dynamic in-kernel slicing of this resident block.
    x_ext = jnp.pad(x_pcl, ((0, 0), (0, 0), (2 * pad, 2 * pad + (L_round - L))))

    kern = functools.partial(_temporal_block_kernel,
                             has_ds, K, dilation, pad, L, T)

    in_specs = [
        pl.BlockSpec((None, cin_p, L_ext), lambda n, j: (n, 0, 0)),        # x
        pl.BlockSpec((cout_p, K * cin_p), lambda n, j: (0, 0)),            # w1
        pl.BlockSpec((cout_p, 1), lambda n, j: (0, 0)),                    # b1
        pl.BlockSpec((cout_p, K * cout_p), lambda n, j: (0, 0)),           # w2
        pl.BlockSpec((cout_p, 1), lambda n, j: (0, 0)),                    # b2
    ]
    args = [x_ext, w1m, b1, w2m, b2]
    if has_ds:
        in_specs += [
            pl.BlockSpec((cout_p, cin_p), lambda n, j: (0, 0)),            # wd
            pl.BlockSpec((cout_p, 1), lambda n, j: (0, 0)),                # bd
        ]
        args += [wdm, bd]

    out = pl.pallas_call(
        kern,
        out_shape=jax.ShapeDtypeStruct((N, cout_p, L_round), jnp.bfloat16),
        grid_spec=pltpu.PrefetchScalarGridSpec(
            num_scalar_prefetch=0,
            grid=(N, nt),
            in_specs=in_specs,
            out_specs=pl.BlockSpec((None, cout_p, T), lambda n, j: (n, 0, j)),
            scratch_shapes=[
                pltpu.VMEM((K * cin_p, T + 2 * pad), jnp.bfloat16),   # win1
                pltpu.VMEM((K * cout_p, T), jnp.bfloat16),            # win2
            ],
        ),
        compiler_params=pltpu.CompilerParams(
            dimension_semantics=("parallel", "parallel")),
    )(*args)

    return out if L_round == L else out[:, :, :L]


# ---------------------------------------------------------------------------
# Host-side parameter packing / forward glue.
# ---------------------------------------------------------------------------

def _round_up(c, m):
    return ((c + m - 1) // m) * m


def _pack_conv_weight(w, cin_p, cout_p):
    # PyTorch (Cout, Cin, K) -> im2col matrix (Cout_p, K*Cin_p) with
    # row/col zero padding for the aligned channel dims.
    cout, cin, K = w.shape
    wt = jnp.transpose(w, (0, 2, 1))                                  # (Cout,K,Cin)
    wt = jnp.pad(wt, ((0, cout_p - cout), (0, 0), (0, cin_p - cin)))
    return wt.reshape(cout_p, K * cin_p).astype(jnp.bfloat16)


def _pack_bias(b, cout_p):
    return jnp.pad(b, (0, cout_p - b.shape[0])).reshape(cout_p, 1).astype(
        jnp.float32)


def tcn_forward(x_ncl, params, kernel_size, tile_l=256):
    """TemporalConvNet forward. x_ncl: (N, C, L) like PyTorch; returns (N, C_last, L)."""
    N, c0, L = x_ncl.shape
    cin, cin_p = c0, _round_up(c0, _CH_ALIGN)
    x = jnp.pad(x_ncl, ((0, 0), (0, cin_p - c0), (0, 0))).astype(jnp.bfloat16)
    for p in params:
        cout = p["w1"].shape[0]
        cout_p = _round_up(cout, _CH_ALIGN)
        w1m = _pack_conv_weight(p["w1"], cin_p, cout_p)
        w2m = _pack_conv_weight(p["w2"], cout_p, cout_p)
        b1 = _pack_bias(p["b1"], cout_p)
        b2 = _pack_bias(p["b2"], cout_p)
        if p["wd"] is not None:
            wdm = jnp.pad(p["wd"][:, :, 0],
                          ((0, cout_p - cout), (0, cin_p - cin))
                          ).astype(jnp.bfloat16)
            bd = _pack_bias(p["bd"], cout_p)
        else:
            wdm, bd = None, None
        x = temporal_block_forward(x, w1m, b1, w2m, b2, wdm, bd,
                                   p["dilation"], kernel_size, tile_l)
        cin, cin_p = cout, cout_p
    return x[:, :cin, :].astype(jnp.float32)


# ---------------------------------------------------------------------------
# Parameter construction (deterministic, weight_norm folded in).
# ---------------------------------------------------------------------------

def _kaiming_uniform(key, shape, fan_in):
    bound = (6.0 / fan_in) ** 0.5
    return jax.random.uniform(key, shape, jnp.float32, -bound, bound)


def _weight_norm_fold(v, g):
    # v: (Cout, Cin, K), g: (Cout,) ; norm over dims (1, 2) per output channel
    norm = jnp.sqrt(jnp.sum(v * v, axis=(1, 2), keepdims=True)) + 1e-12
    return g[:, None, None] * v / norm


def make_tcn_params(key, num_inputs, num_channels, kernel_size):
    def q(a):  # round weights to bf16-representable values (kernel cast is lossless)
        return a.astype(jnp.bfloat16).astype(jnp.float32)

    params = []
    for i, out_ch in enumerate(num_channels):
        in_ch = num_inputs if i == 0 else num_channels[i - 1]
        key, k1, k2, k3, k4, k5, k6, k7, k8 = jax.random.split(key, 9)
        v1 = _kaiming_uniform(k1, (out_ch, in_ch, kernel_size), in_ch * kernel_size)
        g1 = 1.0 + 0.1 * jax.random.uniform(k2, (out_ch,), jnp.float32)
        b1 = _kaiming_uniform(k3, (out_ch,), in_ch * kernel_size)
        v2 = _kaiming_uniform(k4, (out_ch, out_ch, kernel_size), out_ch * kernel_size)
        g2 = 1.0 + 0.1 * jax.random.uniform(k5, (out_ch,), jnp.float32)
        b2 = _kaiming_uniform(k6, (out_ch,), out_ch * kernel_size)
        w1 = q(_weight_norm_fold(v1, g1))   # (Cout, Cin, K)  PyTorch layout
        w2 = q(_weight_norm_fold(v2, g2))
        if in_ch != out_ch:
            wd = q(_kaiming_uniform(k7, (out_ch, in_ch, 1), in_ch))
            bd = _kaiming_uniform(k8, (out_ch,), in_ch)
        else:
            wd, bd = None, None
        params.append(dict(w1=w1, b1=b1, w2=w2, b2=b2, wd=wd, bd=bd,
                           dilation=2 ** i))
    return params


# ---------------------------------------------------------------------------
# Pure-JAX reference (for verification).
# ---------------------------------------------------------------------------

def _ref_conv1d(x_ncl, w_oik, b, dilation, pad):
    y = jax.lax.conv_general_dilated(
        x_ncl, w_oik, window_strides=(1,), padding=[(pad, pad)],
        rhs_dilation=(dilation,), dimension_numbers=("NCH", "OIH", "NCH"))
    return y + b[None, :, None]


def tcn_reference(x_ncl, params, kernel_size):
    x = x_ncl
    for p in params:
        d = p["dilation"]
        pad = (kernel_size - 1) // 2 * d
        h1 = _elu(_ref_conv1d(x, p["w1"], p["b1"], d, pad))
        h2 = _elu(_ref_conv1d(h1, p["w2"], p["b2"], d, pad))
        res = x if p["wd"] is None else _ref_conv1d(x, p["wd"], p["bd"], 1, 0)
        x = _elu(h2 + res)
    return x


if __name__ == "__main__":
    # TemporalConvNet(num_inputs=4, num_channels=[8, 8, 16], kernel_size=7)
    # Levels: 4->8 (d=1, downsample), 8->8 (d=2, identity res), 8->16 (d=4, downsample).
    key = jax.random.PRNGKey(0)
    num_inputs, num_channels, kernel_size = 4, [8, 8, 16], 7
    N, L = 2, 256  # L=256 with tile_l=128 exercises the halo'd L-tiling path

    kx, kp = jax.random.split(key)
    x = jax.random.normal(kx, (N, num_inputs, L), jnp.float32)
    x = x.astype(jnp.bfloat16).astype(jnp.float32)  # bf16-representable input

    params = make_tcn_params(kp, num_inputs, num_channels, kernel_size)

    y = jax.block_until_ready(tcn_forward(x, params, kernel_size, tile_l=128))
    y_ref = jax.block_until_ready(tcn_reference(x, params, kernel_size))

    assert y.shape == (N, num_channels[-1], L), y.shape
    max_err = float(jnp.max(jnp.abs(y - y_ref)))
    # bf16 activations / MXU feeds vs. f32 reference -> loose-ish tolerance.
    assert jnp.allclose(y, y_ref, rtol=5e-2, atol=5e-2), max_err

    print("KERNEL_OK")
</pallas_src>

<mosaic_0001>
module attributes {stable_mosaic.version = 11 : i64} {
  func.func @_temporal_block_kernel(%arg0: i32, %arg1: i32, %arg2: memref<1x16x268xbf16, #tpu.memory_space<vmem>>, %arg3: memref<16x112xbf16, #tpu.memory_space<vmem>>, %arg4: memref<16x1xf32, #tpu.memory_space<vmem>>, %arg5: memref<16x112xbf16, #tpu.memory_space<vmem>>, %arg6: memref<16x1xf32, #tpu.memory_space<vmem>>, %arg7: memref<16x16xbf16, #tpu.memory_space<vmem>>, %arg8: memref<16x1xf32, #tpu.memory_space<vmem>>, %arg9: memref<1x16x128xbf16, #tpu.memory_space<vmem>>, %arg10: memref<112x134xbf16, #tpu.memory_space<vmem>>, %arg11: memref<112x128xbf16, #tpu.memory_space<vmem>>) attributes {dimension_semantics = [#tpu.dimension_semantics<parallel>, #tpu.dimension_semantics<parallel>], iteration_bounds = array<i64: 2, 2>, scalar_prefetch = 0 : i64, scratch_operands = 2 : i64, tpu.core_type = #tpu.core_type<tc>, window_params = [{transform_indices = @transform_0, window_bounds = array<i64: 1, 16, 268>}, {pipeline_mode = #tpu.pipeline_mode<synchronous>, transform_indices = @transform_1, window_bounds = array<i64: 16, 112>}, {pipeline_mode = #tpu.pipeline_mode<synchronous>, transform_indices = @transform_2, window_bounds = array<i64: 16, 1>}, {pipeline_mode = #tpu.pipeline_mode<synchronous>, transform_indices = @transform_3, window_bounds = array<i64: 16, 112>}, {pipeline_mode = #tpu.pipeline_mode<synchronous>, transform_indices = @transform_4, window_bounds = array<i64: 16, 1>}, {pipeline_mode = #tpu.pipeline_mode<synchronous>, transform_indices = @transform_5, window_bounds = array<i64: 16, 16>}, {pipeline_mode = #tpu.pipeline_mode<synchronous>, transform_indices = @transform_6, window_bounds = array<i64: 16, 1>}, {transform_indices = @transform_7, window_bounds = array<i64: 1, 16, 128>}]} {
    %c128_i32 = arith.constant 128 : i32
    %0 = arith.muli %arg1, %c128_i32 : i32
    %1 = tpu.assume_multiple %0, 128 : i32
    %c0 = arith.constant 0 : index
    %c0_0 = arith.constant 0 : index
    %2 = arith.index_cast %1 : i32 to index
    %3 = vector.load %arg2[%c0, %c0_0, %2] : memref<1x16x268xbf16, #tpu.memory_space<vmem>>, vector<1x16x140xbf16>
    %4 = vector.shape_cast %3 : vector<1x16x140xbf16> to vector<16x140xbf16>
    %5 = vector.extract_strided_slice %4 {offsets = [0, 0], sizes = [16, 134], strides = [1, 1]} : vector<16x140xbf16> to vector<16x134xbf16>
    %c0_1 = arith.constant 0 : index
    %c0_2 = arith.constant 0 : index
    %6 = vector.load %arg10[%c0_1, %c0_2] : memref<112x134xbf16, #tpu.memory_space<vmem>>, vector<16x134xbf16>
    tpu.vector_store %arg10[%c0_1, %c0_2], %5 {strides = array<i32>} : memref<112x134xbf16, #tpu.memory_space<vmem>>, vector<16x134xbf16>,
    %7 = vector.extract_strided_slice %4 {offsets = [0, 1], sizes = [16, 134], strides = [1, 1]} : vector<16x140xbf16> to vector<16x134xbf16>
    %c16 = arith.constant 16 : index
    %c0_3 = arith.constant 0 : index
    %8 = vector.load %arg10[%c16, %c0_3] : memref<112x134xbf16, #tpu.memory_space<vmem>>, vector<16x134xbf16>
    tpu.vector_store %arg10[%c16, %c0_3], %7 {strides = array<i32>} : memref<112x134xbf16, #tpu.memory_space<vmem>>, vector<16x134xbf16>,
    %9 = vector.extract_strided_slice %4 {offsets = [0, 2], sizes = [16, 134], strides = [1, 1]} : vector<16x140xbf16> to vector<16x134xbf16>
    %c32 = arith.constant 32 : index
    %c0_4 = arith.constant 0 : index
    %10 = vector.load %arg10[%c32, %c0_4] : memref<112x134xbf16, #tpu.memory_space<vmem>>, vector<16x134xbf16>
    tpu.vector_store %arg10[%c32, %c0_4], %9 {strides = array<i32>} : memref<112x134xbf16, #tpu.memory_space<vmem>>, vector<16x134xbf16>,
    %11 = vector.extract_strided_slice %4 {offsets = [0, 3], sizes = [16, 134], strides = [1, 1]} : vector<16x140xbf16> to vector<16x134xbf16>
    %c48 = arith.constant 48 : index
    %c0_5 = arith.constant 0 : index
    %12 = vector.load %arg10[%c48, %c0_5] : memref<112x134xbf16, #tpu.memory_space<vmem>>, vector<16x134xbf16>
    tpu.vector_store %arg10[%c48, %c0_5], %11 {strides = array<i32>} : memref<112x134xbf16, #tpu.memory_space<vmem>>, vector<16x134xbf16>,
    %13 = vector.extract_strided_slice %4 {offsets = [0, 4], sizes = [16, 134], strides = [1, 1]} : vector<16x140xbf16> to vector<16x134xbf16>
    %c64 = arith.constant 64 : index
    %c0_6 = arith.constant 0 : index
    %14 = vector.load %arg10[%c64, %c0_6] : memref<112x134xbf16, #tpu.memory_space<vmem>>, vector<16x134xbf16>
    tpu.vector_store %arg10[%c64, %c0_6], %13 {strides = array<i32>} : memref<112x134xbf16, #tpu.memory_space<vmem>>, vector<16x134xbf16>,
    %15 = vector.extract_strided_slice %4 {offsets = [0, 5], sizes = [16, 134], strides = [1, 1]} : vector<16x140xbf16> to vector<16x134xbf16>
    %c80 = arith.constant 80 : index
    %c0_7 = arith.constant 0 : index
    %16 = vector.load %arg10[%c80, %c0_7] : memref<112x134xbf16, #tpu.memory_space<vmem>>, vector<16x134xbf16>
    tpu.vector_store %arg10[%c80, %c0_7], %15 {strides = array<i32>} : memref<112x134xbf16, #tpu.memory_space<vmem>>, vector<16x134xbf16>,
    %17 = vector.extract_strided_slice %4 {offsets = [0, 6], sizes = [16, 134], strides = [1, 1]} : vector<16x140xbf16> to vector<16x134xbf16>
    %c96 = arith.constant 96 : index
    %c0_8 = arith.constant 0 : index
    %18 = vector.load %arg10[%c96, %c0_8] : memref<112x134xbf16, #tpu.memory_space<vmem>>, vector<16x134xbf16>
    tpu.vector_store %arg10[%c96, %c0_8], %17 {strides = array<i32>} : memref<112x134xbf16, #tpu.memory_space<vmem>>, vector<16x134xbf16>,
    %c0_9 = arith.constant 0 : index
    %c0_10 = arith.constant 0 : index
    %19 = vector.load %arg3[%c0_9, %c0_10] : memref<16x112xbf16, #tpu.memory_space<vmem>>, vector<16x112xbf16>
    %c0_11 = arith.constant 0 : index
    %c0_12 = arith.constant 0 : index
    %20 = vector.load %arg10[%c0_11, %c0_12] : memref<112x134xbf16, #tpu.memory_space<vmem>>, vector<112x134xbf16>
    %cst = arith.constant dense<0.000000e+00> : vector<16x134xf32>
    %21 = tpu.matmul %19, %20, %cst {dimension_numbers = #tpu.dot_dimension_numbers<[1], [0], [0], [1], [0, 0, 1, 1], [], []>} : vector<16x112xbf16>, vector<112x134xbf16>, vector<16x134xf32> -> vector<16x134xf32>
    %c0_13 = arith.constant 0 : index
    %c0_14 = arith.constant 0 : index
    %22 = vector.load %arg4[%c0_13, %c0_14] : memref<16x1xf32, #tpu.memory_space<vmem>>, vector<16x1xf32>
    %23 = vector.broadcast %22 : vector<16x1xf32> to vector<16x134xf32>
    %24 = arith.addf %21, %23 : vector<16x134xf32>
    %cst_15 = arith.constant 0.000000e+00 : f32
    %25 = vector.broadcast %cst_15 : f32 to vector<16x134xf32>
    %26 = arith.cmpf ogt, %24, %25 : vector<16x134xf32>
    %cst_16 = arith.constant 0.000000e+00 : f32
    %27 = vector.broadcast %cst_16 : f32 to vector<16x134xf32>
    %28 = arith.minimumf %24, %27 : vector<16x134xf32>
    %29 = math.exp %28 : vector<16x134xf32>
    %cst_17 = arith.constant 1.000000e+00 : f32
    %30 = vector.broadcast %cst_17 : f32 to vector<16x134xf32>
    %31 = arith.subf %29, %30 : vector<16x134xf32>
    %32 = arith.select %26, %24, %31 : vector<16x134xi1>, vector<16x134xf32>
    %33 = tpu.iota {dimensions = array<i32: 1>} : vector<16x134xi32>
    %c128_i32_18 = arith.constant 128 : i32
    %34 = arith.muli %arg1, %c128_i32_18 : i32
    %c3_i32 = arith.constant 3 : i32
    %35 = arith.subi %34, %c3_i32 : i32
    %36 = vector.broadcast %35 : i32 to vector<16x134xi32>
    %37 = arith.addi %36, %33 : vector<16x134xi32>
    %c0_i32 = arith.constant 0 : i32
    %38 = vector.broadcast %c0_i32 : i32 to vector<16x134xi32>
    %39 = arith.cmpi sge, %37, %38 : vector<16x134xi32>
    %c256_i32 = arith.constant 256 : i32
    %40 = vector.broadcast %c256_i32 : i32 to vector<16x134xi32>
    %41 = arith.cmpi slt, %37, %40 : vector<16x134xi32>
    %42 = arith.andi %39, %41 : vector<16x134xi1>
    %cst_19 = arith.constant 0.000000e+00 : f32
    %43 = vector.broadcast %cst_19 : f32 to vector<16x134xf32>
    %44 = arith.select %42, %32, %43 : vector<16x134xi1>, vector<16x134xf32>
    %45 = arith.truncf %44 : vector<16x134xf32> to vector<16x134xbf16>
    %46 = vector.extract_strided_slice %45 {offsets = [0, 0], sizes = [16, 128], strides = [1, 1]} : vector<16x134xbf16> to vector<16x128xbf16>
    %c0_20 = arith.constant 0 : index
    %c0_21 = arith.constant 0 : index
    %47 = vector.load %arg11[%c0_20, %c0_21] : memref<112x128xbf16, #tpu.memory_space<vmem>>, vector<16x128xbf16>
    tpu.vector_store %arg11[%c0_20, %c0_21], %46 {strides = array<i32>} : memref<112x128xbf16, #tpu.memory_space<vmem>>, vector<16x128xbf16>,
    %48 = vector.extract_strided_slice %45 {offsets = [0, 1], sizes = [16, 128], strides = [1, 1]} : vector<16x134xbf16> to vector<16x128xbf16>
    %c16_22 = arith.constant 16 : index
    %c0_23 = arith.constant 0 : index
    %49 = vector.load %arg11[%c16_22, %c0_23] : memref<112x128xbf16, #tpu.memory_space<vmem>>, vector<16x128xbf16>
    tpu.vector_store %arg11[%c16_22, %c0_23], %48 {strides = array<i32>} : memref<112x128xbf16, #tpu.memory_space<vmem>>, vector<16x128xbf16>,
    %50 = vector.extract_strided_slice %45 {offsets = [0, 2], sizes = [16, 128], strides = [1, 1]} : vector<16x134xbf16> to vector<16x128xbf16>
    %c32_24 = arith.constant 32 : index
    %c0_25 = arith.constant 0 : index
    %51 = vector.load %arg11[%c32_24, %c0_25] : memref<112x128xbf16, #tpu.memory_space<vmem>>, vector<16x128xbf16>
    tpu.vector_store %arg11[%c32_24, %c0_25], %50 {strides = array<i32>} : memref<112x128xbf16, #tpu.memory_space<vmem>>, vector<16x128xbf16>,
    %52 = vector.extract_strided_slice %45 {offsets = [0, 3], sizes = [16, 128], strides = [1, 1]} : vector<16x134xbf16> to vector<16x128xbf16>
    %c48_26 = arith.constant 48 : index
    %c0_27 = arith.constant 0 : index
    %53 = vector.load %arg11[%c48_26, %c0_27] : memref<112x128xbf16, #tpu.memory_space<vmem>>, vector<16x128xbf16>
    tpu.vector_store %arg11[%c48_26, %c0_27], %52 {strides = array<i32>} : memref<112x128xbf16, #tpu.memory_space<vmem>>, vector<16x128xbf16>,
    %54 = vector.extract_strided_slice %45 {offsets = [0, 4], sizes = [16, 128], strides = [1, 1]} : vector<16x134xbf16> to vector<16x128xbf16>
    %c64_28 = arith.constant 64 : index
    %c0_29 = arith.constant 0 : index
    %55 = vector.load %arg11[%c64_28, %c0_29] : memref<112x128xbf16, #tpu.memory_space<vmem>>, vector<16x128xbf16>
    tpu.vector_store %arg11[%c64_28, %c0_29], %54 {strides = array<i32>} : memref<112x128xbf16, #tpu.memory_space<vmem>>, vector<16x128xbf16>,
    %56 = vector.extract_strided_slice %45 {offsets = [0, 5], sizes = [16, 128], strides = [1, 1]} : vector<16x134xbf16> to vector<16x128xbf16>
    %c80_30 = arith.constant 80 : index
    %c0_31 = arith.constant 0 : index
    %57 = vector.load %arg11[%c80_30, %c0_31] : memref<112x128xbf16, #tpu.memory_space<vmem>>, vector<16x128xbf16>
    tpu.vector_store %arg11[%c80_30, %c0_31], %56 {strides = array<i32>} : memref<112x128xbf16, #tpu.memory_space<vmem>>, vector<16x128xbf16>,
    %58 = vector.extract_strided_slice %45 {offsets = [0, 6], sizes = [16, 128], strides = [1, 1]} : vector<16x134xbf16> to vector<16x128xbf16>
    %c96_32 = arith.constant 96 : index
    %c0_33 = arith.constant 0 : index
    %59 = vector.load %arg11[%c96_32, %c0_33] : memref<112x128xbf16, #tpu.memory_space<vmem>>, vector<16x128xbf16>
    tpu.vector_store %arg11[%c96_32, %c0_33], %58 {strides = array<i32>} : memref<112x128xbf16, #tpu.memory_space<vmem>>, vector<16x128xbf16>,
    %c0_34 = arith.constant 0 : index
    %c0_35 = arith.constant 0 : index
    %60 = vector.load %arg5[%c0_34, %c0_35] : memref<16x112xbf16, #tpu.memory_space<vmem>>, vector<16x112xbf16>
    %c0_36 = arith.constant 0 : index
    %c0_37 = arith.constant 0 : index
    %61 = vector.load %arg11[%c0_36, %c0_37] : memref<112x128xbf16, #tpu.memory_space<vmem>>, vector<112x128xbf16>
    %cst_38 = arith.constant dense<0.000000e+00> : vector<16x128xf32>
    %62 = tpu.matmul %60, %61, %cst_38 {dimension_numbers = #tpu.dot_dimension_numbers<[1], [0], [0], [1], [0, 0, 1, 1], [], []>} : vector<16x112xbf16>, vector<112x128xbf16>, vector<16x128xf32> -> vector<16x128xf32>
    %c0_39 = arith.constant 0 : index
    %c0_40 = arith.constant 0 : index
    %63 = vector.load %arg6[%c0_39, %c0_40] : memref<16x1xf32, #tpu.memory_space<vmem>>, vector<16x1xf32>
    %64 = vector.broadcast %63 : vector<16x1xf32> to vector<16x128xf32>
    %65 = arith.addf %62, %64 : vector<16x128xf32>
    %cst_41 = arith.constant 0.000000e+00 : f32
    %66 = vector.broadcast %cst_41 : f32 to vector<16x128xf32>
    %67 = arith.cmpf ogt, %65, %66 : vector<16x128xf32>
    %cst_42 = arith.constant 0.000000e+00 : f32
    %68 = vector.broadcast %cst_42 : f32 to vector<16x128xf32>
    %69 = arith.minimumf %65, %68 : vector<16x128xf32>
    %70 = math.exp %69 : vector<16x128xf32>
    %cst_43 = arith.constant 1.000000e+00 : f32
    %71 = vector.broadcast %cst_43 : f32 to vector<16x128xf32>
    %72 = arith.subf %70, %71 : vector<16x128xf32>
    %73 = arith.select %67, %65, %72 : vector<16x128xi1>, vector<16x128xf32>
    %74 = vector.extract_strided_slice %4 {offsets = [0, 6], sizes = [16, 128], strides = [1, 1]} : vector<16x140xbf16> to vector<16x128xbf16>
    %c0_44 = arith.constant 0 : index
    %c0_45 = arith.constant 0 : index
    %75 = vector.load %arg7[%c0_44, %c0_45] : memref<16x16xbf16, #tpu.memory_space<vmem>>, vector<16x16xbf16>
    %cst_46 = arith.constant dense<0.000000e+00> : vector<16x128xf32>
    %76 = tpu.matmul %75, %74, %cst_46 {dimension_numbers = #tpu.dot_dimension_numbers<[1], [0], [0], [1], [0, 0, 1, 1], [], []>} : vector<16x16xbf16>, vector<16x128xbf16>, vector<16x128xf32> -> vector<16x128xf32>
    %c0_47 = arith.constant 0 : index
    %c0_48 = arith.constant 0 : index
    %77 = vector.load %arg8[%c0_47, %c0_48] : memref<16x1xf32, #tpu.memory_space<vmem>>, vector<16x1xf32>
    %78 = vector.broadcast %77 : vector<16x1xf32> to vector<16x128xf32>
    %79 = arith.addf %76, %78 : vector<16x128xf32>
    %80 = arith.addf %73, %79 : vector<16x128xf32>
    %cst_49 = arith.constant 0.000000e+00 : f32
    %81 = vector.broadcast %cst_49 : f32 to vector<16x128xf32>
    %82 = arith.cmpf ogt, %80, %81 : vector<16x128xf32>
    %cst_50 = arith.constant 0.000000e+00 : f32
    %83 = vector.broadcast %cst_50 : f32 to vector<16x128xf32>
    %84 = arith.minimumf %80, %83 : vector<16x128xf32>
    %85 = math.exp %84 : vector<16x128xf32>
    %cst_51 = arith.constant 1.000000e+00 : f32
    %86 = vector.broadcast %cst_51 : f32 to vector<16x128xf32>
    %87 = arith.subf %85, %86 : vector<16x128xf32>
    %88 = arith.select %82, %80, %87 : vector<16x128xi1>, vector<16x128xf32>
    %89 = arith.truncf %88 : vector<16x128xf32> to vector<16x128xbf16>
    %c0_52 = arith.constant 0 : index
    %c0_53 = arith.constant 0 : index
    %c0_54 = arith.constant 0 : index
    %90 = vector.load %arg9[%c0_52, %c0_53, %c0_54] : memref<1x16x128xbf16, #tpu.memory_space<vmem>>, vector<1x16x128xbf16>
    %91 = vector.shape_cast %90 : vector<1x16x128xbf16> to vector<16x128xbf16>
    %92 = vector.shape_cast %89 : vector<16x128xbf16> to vector<1x16x128xbf16>
    tpu.vector_store %arg9[%c0_52, %c0_53, %c0_54], %92 {strides = array<i32>} : memref<1x16x128xbf16, #tpu.memory_space<vmem>>, vector<1x16x128xbf16>,
    return
  }
  func.func @transform_0(%arg0: i32, %arg1: i32) -> (i32, i32, i32) {
    %c0_i32 = arith.constant 0 : i32
    %c0_i32_0 = arith.constant 0 : i32
    %c0_i32_1 = arith.constant 0 : i32
    return %arg0, %c0_i32, %c0_i32_0 : i32, i32, i32
  }
  func.func @transform_1(%arg0: i32, %arg1: i32) -> (i32, i32) {
    %c0_i32 = arith.constant 0 : i32
    %c0_i32_0 = arith.constant 0 : i32
    %c0_i32_1 = arith.constant 0 : i32
    return %c0_i32, %c0_i32_0 : i32, i32
  }
  func.func @transform_2(%arg0: i32, %arg1: i32) -> (i32, i32) {
    %c0_i32 = arith.constant 0 : i32
    %c0_i32_0 = arith.constant 0 : i32
    %c0_i32_1 = arith.constant 0 : i32
    return %c0_i32, %c0_i32_0 : i32, i32
  }
  func.func @transform_3(%arg0: i32, %arg1: i32) -> (i32, i32) {
    %c0_i32 = arith.constant 0 : i32
    %c0_i32_0 = arith.constant 0 : i32
    %c0_i32_1 = arith.constant 0 : i32
    return %c0_i32, %c0_i32_0 : i32, i32
  }
  func.func @transform_4(%arg0: i32, %arg1: i32) -> (i32, i32) {
    %c0_i32 = arith.constant 0 : i32
    %c0_i32_0 = arith.constant 0 : i32
    %c0_i32_1 = arith.constant 0 : i32
    return %c0_i32, %c0_i32_0 : i32, i32
  }
  func.func @transform_5(%arg0: i32, %arg1: i32) -> (i32, i32) {
    %c0_i32 = arith.constant 0 : i32
    %c0_i32_0 = arith.constant 0 : i32
    %c0_i32_1 = arith.constant 0 : i32
    return %c0_i32, %c0_i32_0 : i32, i32
  }
  func.func @transform_6(%arg0: i32, %arg1: i32) -> (i32, i32) {
    %c0_i32 = arith.constant 0 : i32
    %c0_i32_0 = arith.constant 0 : i32
    %c0_i32_1 = arith.constant 0 : i32
    return %c0_i32, %c0_i32_0 : i32, i32
  }
  func.func @transform_7(%arg0: i32, %arg1: i32) -> (i32, i32, i32) {
    %c0_i32 = arith.constant 0 : i32
    %c0_i32_0 = arith.constant 0 : i32
    return %arg0, %c0_i32, %arg1 : i32, i32, i32
  }
}

</mosaic_0001>

<bundles_post_ra>
// kernel: tpu_custom_call.1
= control target key start
LH: loop header
LB: loop body
LE: loop exit
PB: predicated region body
PF: predicated region fallthrough
CT: control target
= control target key end

     0   :  { %12 = vsyncpa [#allocation5], 0  ;;  %s1486_s0 = inlined_call_operand.vmem [shape: bf16[2,16,268], index: 0, kind: input, shape index: {}]   ;;  %s1487_s1 = inlined_call_operand.hbm [shape: bf16[16,112], index: 1, kind: input, shape index: {}]   ;;  %s1488_s2 = inlined_call_operand.vmem [shape: f32[16,1], index: 2, kind: input, shape index: {}]   ;;  %s1489_s3 = inlined_call_operand.vmem [shape: bf16[16,112], index: 3, kind: input, shape index: {}]   ;;  %s1490_s4 = inlined_call_operand.vmem [shape: f32[16,1], index: 4, kind: input, shape index: {}]   ;;  %s1491_s5 = inlined_call_operand.vmem [shape: bf16[16,16], index: 5, kind: input, shape index: {}]   ;;  %s1492_s6 = inlined_call_operand.vmem [shape: f32[16,1], index: 6, kind: input, shape index: {}]   ;;  %s1493_s7 = inlined_call_operand.hbm [shape: bf16[2,16,256], index: 7, kind: output, shape index: {}]  }
   0x1   :  { %13 = vsyncpa [#allocation6], 0 }
   0x2   :  { %15 = vsyncpa [#allocation6 + $0x1], 0  ;;  %s1213_s24 = smov 0   ;;  %s1215_s25 = smov 0  }
   0x3   :  { %s1217_s26 = smov 0   ;;  %s1219_s27 = smov 0  }
   0x4   :  { %s1221_s28 = smov 0   ;;  %s1223_s29 = smov 0  }
   0x5   :  { %s1225_s30 = smov 0   ;;  %s1227_s8 = smov 0  }
   0x6 LB: > { %s829_s9 = sadd.s32 4294967295, %s1155_s8   ;;  %s830_s10 = sadd.s32 4294967294, %s1155_s8   ;;  %s1155_s8 = sphi %s1227_s8, %s21_s8   ;;  %s1151_s30 = sphi %s1225_s30, %s1525_s30   ;;  %s1147_s29 = sphi %s1223_s29, %s1524_s29   ;;  %s1143_s28 = sphi %s1221_s28, %s1523_s28   ;;  %s1139_s27 = sphi %s1219_s27, %s1522_s27   ;;  %s1135_s26 = sphi %s1217_s26, %s1521_s26   ;;  %s1131_s25 = sphi %s1215_s25, %s1520_s25   ;;  %s1127_s24 = sphi %s1213_s24, %s1519_s24  }
   0x7   : > { %s30_s11 = sadd.s32 1, %s1147_s29  ;;  %s33_s12 = sadd.s32 1, %s1151_s30 }
   0x8   : > { %p31_p0 = scmp.ge.s32.totalorder %s30_s11, 2  ;;  %s194_s13 = sadd.s32 1, %s1135_s26 }
   0x9   : > { %p204_p1 = scmp.ne.s32.totalorder %s1135_s26, %s1131_s25  ;;  %p205_p2 = scmp.eq.s32.totalorder %s829_s9, 3 }
   0xa   : > { %s1527_s11 = smov (%p31_p0, %s30_s11), 0  ;;  %s1529_s12 = smov (!%p31_p0, %s33_s12), %s1151_s30 }
   0xb   : > { %1502 = sst [smem:[#allocation10_spill]] %s1527_s11  ;;  %s190_s14 = ssub.s32 %s1147_s29, %s1527_s11 }
   0xc   : > { %p1265_p3 = por %p205_p2, %p204_p1  ;;  %p35_p4 = scmp.ge.s32.totalorder %s1529_s12, 2 }
   0xd   : > { %p210_p5 = scmp.ne.s32.totalorder %s1131_s25, %s1127_s24  ;;  %p211_p6 = scmp.eq.s32.totalorder %s830_s10, 3 }
   0xe   : > { %s1503_s15 = scalar_select %p1265_p3, 1, 0 }
   0xf   : > { %p831_p7 = scmp.ge.s32.totalorder %s1155_s8, 1  ;;  %s1531_s12 = smov (%p35_p4, %s1529_s12), 0 }
  0x10   : > { %1504 = sst [smem:[#allocation11_spill]] %s1531_s12  ;;  %p1274_p8 = por %p211_p6, %p210_p5 }
  0x11   : > { %p218_p9 = scmp.lt.s32.totalorder %s1155_s8, 5  ;;  %s189_s17 = ssub.s32 %s1151_s30, %s1531_s12 }
  0x12   : > { %s1505_s16 = scalar_select %p1274_p8, 1, 0 }
  0x13   : > { %s191_s18 = sor.u32 %s190_s14, %s189_s17  ;;  %p1281_p10 = pnand %p831_p7, %p218_p9 }
  0x14   : > { %p192_p11 = scmp.eq.s32.totalorder %s191_s18, 0  ;;  %p1285_p12 = scmp.eq.s32.totalorder %s829_s9, 0 }
  0x15   : > { %s1506_s19 = scalar_select %p1281_p10, 1, 0 }
  0x16   : > { %s1507_s20 = scalar_select %p1285_p12, 1, 0 }
  0x17   : > { %p915_p13 = pneg %p1281_p10  ;;  %s1157_s22 = smov [#allocation4]  }
  0x18   : > { %s1292_s21 = scalar_select %p192_p11, %s1135_s26, %s194_s13  }
  0x19   : > { %s230_s23 = sshll.u32 %s1157_s22, 4  ;;  %p1296_p0 = pnand %p1285_p12, %p915_p13  ;;  %s231_s23 = int_to_ptr.vmem [resolvable:$true] %s230_s23 }
  0x1a   : > { %s1029_s9 = scalar_lea.hbm %s1487_s1, 128 }
  0x1b   : > { %p1030_p1 = scmp.ne.s32.totalorder %s1487_s1, %s1029_s9  ;;  %p1031_p2 = pneg %p1296_p0 }
  0x1c   : > { %p1036_p6 = scmp.lt.u32.totalorder %s1029_s9, %s1487_s1 }
  0x1d   : > { %p1032_p4 = pnand %p1031_p2, %p1030_p1 }
  0x1f   : > { %p1033_p5 = pneg %p1032_p4 }
  0x21   : > { %p1038_p7 = pnand %p1036_p6, %p1033_p5 }
  0x23   : > { %1041 = shalt.err (!%p1038_p7)
}
  0x24   : > { %s1042_s11 = scalar_lea.vmem %s231_s23, 128  ;;  %p1050_p8 = scmp.lt.s32.totalorder %s231_s23, %s231_s23 }
  0x25   : > { %p1043_p9 = scmp.ne.s32.totalorder %s231_s23, %s1042_s11  ;;  %p1051_p3 = scmp.lt.s32.totalorder %s1042_s11, %s1042_s11 }
  0x27   : > { %p1045_p11 = pnand %p1043_p9, %p1031_p2  ;;  %p1052_p12 = por %p1051_p3, %p1050_p8 }
  0x29   : > { %p1046_p13 = pneg %p1045_p11 }
  0x2b   : > { %p1053_p10 = pnand %p1052_p12, %p1046_p13 }
  0x2d   : > { %1056 = shalt.err (!%p1053_p10)
}
  0x2e   : > { %s1158_s12 = smov 64   ;;  %s1159_s14 = smov 4  }
  0x2f   : > { %918 = dma.hbm_to_vmem [thread:$0]  (!%p1296_p0), %s1487_s1, 128, %s231_s23, [#allocation5], %s1158_s12, %s1158_s12, %s1159_s14  }
  0x30   : > { %p1509_p1 = scmp.ne.s32.totalorder %s1506_s19, 0 }
  0x31   : > { %p1510_p4 = scmp.ne.s32.totalorder (!%p1509_p1), %s1507_s20, 0 }
  0x32   : > { %269 = sbr.rel (%p1509_p1) target bundleno = 867 (0x363), region = 48 }
  0x39   : > { %1118 = dma.done.wait (%p1510_p4), [#allocation5], 128  }
  0x3a   : > { %1120 = vsyncadd (%p1510_p4), [#allocation5], 4294967168  ;;  %p301_p3 = scmp.lt.s32.totalorder %s1143_s28, 1  ;;  %s838_s11 = sshll.u32 %s1139_s27, 7  ;;  %vm325_vm0 = vcmask 48128   ;;  %v1166_v3 = vmov 0   ;;  %v491_v39 = vlaneseq }
  0x3b   : > { %s308_s10 = sshra.s32 %s838_s11, 7  ;;  %s1160_s20 = smov 126   ;;  %456 = vmatprep.mubr.bf16.mxu0 %v1166_v3  ;;  %1005 = vset.pattern.permute.xlu0 %v1166_v3  ;;  %v1167_v4 = vmov 0.0   ;;  %v403_v5 = vld [vmem:[%s1488_s2] sm:$0xff]  ;;  %v404_v6 = vld [vmem:[%s1488_s2 + $0x8] sm:$0xff]  ;;  %vm1168_vm1 = vmmov 0  }
  0x3c   : > { %s302_s9 = scalar_select %p301_p3, %s1143_s28, 1  ;;  %1006 = vset.pattern.permute.xlu1 %v1166_v3  ;;  %884 = vmatprep.subr.bf16.mxu1 %v1167_v4  ;;  %vm341_vm2 = vcmask 1031168   ;;  %vm331_vm3 = vcmask 1039360   ;;  %vm351_vm4 = vcmask 1022976   ;;  %vm361_vm5 = vcmask 1014784   ;;  %v1010_v31 = vld [vmem:[#allocation4] sm:$0xff]  }
  0x3d   : > { %s839_s23 = sshll.u32 %s308_s10, 2  ;;  %s1161_s17 = smov 127   ;;  %898 = vmatprep.mubr.msk.bf16.mxu1 %vm1168_vm1, %v1167_v4  ;;  %vm371_vm6 = vcmask 1006592   ;;  %vm1501_vm7 = vcmask 998400   ;;  %vm1500_vm8 = vcmask 916480   ;;  %v1011_v32 = vld [vmem:[%s1491_s5] sm:$0xff]  }
  0x3e   : > { %s908_s13 = smul.u32 24, %s302_s9  ;;  %s1162_s18 = smov 125   ;;  %vm656_vm9 = vcmask 130048   ;;  %v492_v49 = vand.u32 127, %v491_v39 }
  0x3f   : > { %s1163_s10 = smov 124   ;;  %s1164_s9 = smov 123  }
  0x40   : > { %s305_s12 = scalar_lea.vmem %s1486_s0, %s908_s13  ;;  %s1165_s13 = smov 122   ;;  %v493_v53 = vadd.s32 128, %v492_v49 }
  0x41   : > { %s311_s14 = scalar_lea.vmem %s305_s12, %s839_s23  ;;  %s848_s22 = sadd.s32 4294967293, %s838_s11 }
  0x42   : > { %v1007_v0 = vld [vmem:[%s311_s14] ss:$12 sps:$4 sm:$0xff]   ;;  %v1009_v1 = vld [vmem:[%s311_s14 + $0x4] ss:$12 sps:$4 sm:$0xff]   ;;  %v495_v54 = vstv %s848_s22  ;;  %s298_s23 = sand.u32 1, %s1131_s25   ;;  %s860_s22 = sshll.u32 %s1143_s28, 2 }
  0x43   : > { %337 = vrot.lane.b32.xlu1 %v1007_v0, %s1160_s20  ;;  %327 = vrot.lane.b32.xlu0 %v1007_v0, %s1161_s17  ;;  %326 = vst.msk [vmem:[#allocation2 + $0x8] sm:$0xff] %vm325_vm0, %v1009_v1  ;;  %v496_v55 = vadd.s32 %v495_v54, %v492_v49  ;;  %v497_v56 = vadd.s32 %v495_v54, %v493_v53  ;;  %s836_s11 = sshll.u32 %s298_s23, 3  ;;  %p1515_p10 = scmp.ne.s32.totalorder %s1503_s15, 0 }
  0x44   : > { %s300_s19 = scalar_lea.vmem [#allocation7], %s836_s11 }
  0x45   : > { %vm498_vm10 = vcmp.ge.s32.totalorder %v496_v55, 0  ;;  %vm500_vm11 = vcmp.lt.s32.totalorder %v496_v55, 256  ;;  %vm499_vm12 = vcmp.ge.s32.totalorder %v497_v56, 0  ;;  %vm501_vm13 = vcmp.lt.s32.totalorder %v497_v56, 256 }
  0x47   : > { %339 = vrot.lane.b32.xlu1 %v1009_v1, %s1160_s20  ;;  %329 = vrot.lane.b32.xlu0 %v1009_v1, %s1161_s17 }
  0x4a   : > { %v390_v2 = vld [vmem:[#allocation2 + $0x8] sm:$0xff] }
  0x4b   : > { %349 = vrot.lane.b32.xlu1 %v1009_v1, %s1162_s18  ;;  %347 = vrot.lane.b32.xlu0 %v1007_v0, %s1162_s18 }
  0x4c   : > { %424 = vmatprep.subr.bf16.mxu0 %v390_v2 }
  0x4d   : > { %425 = vmatpush1.bf16.msra.mxu0 %v1007_v0 }
  0x4f   : > { %359 = vrot.lane.b32.xlu1 %v1009_v1, %s1163_s10  ;;  %357 = vrot.lane.b32.xlu0 %v1007_v0, %s1163_s10 }
  0x53   : > { %369 = vrot.lane.b32.xlu1 %v1009_v1, %s1164_s9  ;;  %367 = vrot.lane.b32.xlu0 %v1007_v0, %s1164_s9 }
  0x57   : > { %379 = vrot.lane.b32.xlu1 %v1009_v1, %s1165_s13  ;;  %377 = vrot.lane.b32.xlu0 %v1007_v0, %s1165_s13 }
  0x5b   : > { %407 = vperm.xlu0 %1005, %v403_v5   ;;  %412 = vperm.xlu1 %1006, %v404_v6  }
  0xb5   : > { %v338_v7 = vpop.permute.xlu1 %337  ;;  %v328_v8 = vpop.permute.xlu0 %327 }
  0xb9   : > { %v340_v9 = vpop.permute.xlu1 %339  ;;  %v330_v10 = vpop.permute.xlu0 %329 }
  0xba   : > { %v342_v11 = vsel %vm341_vm2, %v338_v7, %v340_v9  ;;  %346 = vst.msk [vmem:[#allocation2 + $0x28] sm:$0xff] %vm325_vm0, %v340_v9  ;;  %v332_v12 = vsel %vm331_vm3, %v328_v8, %v330_v10  ;;  %336 = vst.msk [vmem:[#allocation2 + $0x18] sm:$0xff] %vm325_vm0, %v330_v10 }
  0xbd   : > { %v350_v13 = vpop.permute.xlu1 %349  ;;  %v348_v14 = vpop.permute.xlu0 %347 }
  0xbe   : > { %356 = vst.msk [vmem:[#allocation2 + $0x38] sm:$0xff] %vm325_vm0, %v350_v13  ;;  %v352_v15 = vsel %vm351_vm4, %v348_v14, %v350_v13  ;;  %v564_v14 = vld [vmem:[%s1490_s4] sm:$0xff] }
  0xc1   : > { %v392_v16 = vld [vmem:[#allocation2 + $0x18] sm:$0xff]  ;;  %v360_v17 = vpop.permute.xlu1 %359  ;;  %v358_v18 = vpop.permute.xlu0 %357  ;;  %v394_v19 = vld [vmem:[#allocation2 + $0x28] sm:$0xff] }
  0xc2   : > { %426 = vmatprep.subr.bf16.mxu0 %v392_v16  ;;  %366 = vst.msk [vmem:[#allocation2 + $0x48] sm:$0xff] %vm325_vm0, %v360_v17  ;;  %v362_v20 = vsel %vm361_vm5, %v358_v18, %v360_v17  ;;  %v639_v17 = vld [vmem:[%s1492_s6] sm:$0xff] }
  0xc3   : > { %427 = vmatpush1.bf16.msra.mxu0 %v332_v12 }
  0xc4   : > { %428 = vmatprep.subr.bf16.mxu0 %v394_v19  ;;  %v640_v19 = vld [vmem:[%s1492_s6 + $0x8] sm:$0xff] }
  0xc5   : > { %v370_v21 = vpop.permute.xlu1 %369  ;;  %v368_v22 = vpop.permute.xlu0 %367  ;;  %v396_v23 = vld [vmem:[#allocation2 + $0x38] sm:$0xff] }
  0xc6   : > { %376 = vst.msk [vmem:[#allocation2 + $0x58] sm:$0xff] %vm325_vm0, %v370_v21  ;;  %v372_v24 = vsel %vm371_vm6, %v368_v22, %v370_v21 }
  0xc7   : > { %429 = vmatpush1.bf16.msra.mxu0 %v342_v11 }
  0xc8   : > { %430 = vmatprep.subr.bf16.mxu0 %v396_v23 }
  0xc9   : > { %v380_v25 = vpop.permute.xlu1 %379  ;;  %v378_v26 = vpop.permute.xlu0 %377  ;;  %v398_v27 = vld [vmem:[#allocation2 + $0x48] sm:$0xff] }
  0xca   : > { %386 = vst.msk [vmem:[#allocation2 + $0x68] sm:$0xff] %vm325_vm0, %v380_v25  ;;  %v382_v28 = vsel %vm1501_vm7, %v378_v26, %v380_v25  ;;  %vm1373_vm0 = vmand %vm498_vm10, %vm500_vm11 }
  0xcb   : > { %431 = vmatpush1.bf16.msra.mxu0 %v352_v15  ;;  %vm871_vm7 = vmpackc.low %vm1373_vm0, %vm1373_vm0  ;;  %v565_v15 = vld [vmem:[%s1490_s4 + $0x8] sm:$0xff] }
  0xcc   : > { %432 = vmatprep.subr.bf16.mxu0 %v398_v27 }
  0xcd   : > { %v400_v29 = vld [vmem:[#allocation2 + $0x58] sm:$0xff] }
  0xcf   : > { %433 = vmatpush1.bf16.msra.mxu0 %v362_v20 }
  0xd0   : > { %434 = vmatprep.subr.bf16.mxu0 %v400_v29 }
  0xd1   : > { %v402_v30 = vld [vmem:[#allocation2 + $0x68] sm:$0xff] }
  0xd3   : > { %435 = vmatpush1.bf16.msra.mxu0 %v372_v24 }
  0xd4   : > { %436 = vmatprep.subr.bf16.mxu0 %v402_v30 }
  0xd7   : > { %437 = vmatpush1.bf16.msra.mxu0 %v382_v28 }
  0xd8   : > { %902 = vmatprep.subr.bf16.mxu0 %v1167_v4 }
  0xda   : > { %843 = vmatmul.mubr.msk.bf16.vlgmr.msra.gmra.mrb[0].mxu0 %vm1500_vm8, %v1010_v31  ;;  %v408_v33 = vpop.permute.xlu0 %407  ;;  %v413_v35 = vpop.permute.xlu1 %412 }
  0xdb   : > { %903 = vmatpush3.bf16.msra.mxu0 %v382_v28  ;;  %904 = vmatprep.mubr.msk.bf16.mxu0 %vm1168_vm1, %v1167_v4  ;;  %vm503_vm1 = vmand %vm499_vm12, %vm501_vm13 }
  0xe2   : > { %905 = vmatmul.mubr.msk.bf16.vlgmr.msra.gmra.mrb[4].mxu0 %vm656_vm9, %v1011_v32 }
 0x1ad   : > { %v458_v34 = vpop.f32.mrb[0].mxu0 }
 0x1ae   : > { %v459_v36 = vadd.f32 %v458_v34, %v408_v33  ;;  %v460_v37 = vpop.f32.mrb[1].mxu0 }
 0x1af   : > { %v461_v38 = vadd.f32 %v460_v37, %v408_v33  ;;  %v462_v40 = vpop.f32.mrb[2].mxu0 }
 0x1b0   : > { %v471_v41 = vmin.f32 %v459_v36, 0.0  ;;  %v463_v42 = vadd.f32 %v462_v40, %v413_v35  ;;  %v464_v43 = vpop.f32.mrb[3].mxu0  ;;  %vm467_vm14 = vcmp.gt.f32.partialorder %v459_v36, 0.0  ;;  %v1012_v40 = vld [vmem:[%s1489_s3] sm:$0xff]  }
 0x1b1   : > { %v472_v44 = vmin.f32 %v461_v38, 0.0  ;;  %v465_v45 = vadd.f32 %v464_v43, %v413_v35  ;;  %vm468_vm15 = vcmp.gt.f32.partialorder %v461_v38, 0.0 }
 0x1b2   : > { %v475_v46 = vmul.f32 1.442695, %v471_v41  ;;  %v473_v47 = vmin.f32 %v463_v42, 0.0  ;;  %vm469_vm9 = vcmp.gt.f32.partialorder %v463_v42, 0.0 }
 0x1b3   : > { %v477_v48 = vmul.f32 1.442695, %v472_v44  ;;  %v474_v50 = vmin.f32 %v465_v45, 0.0  ;;  %vm470_vm8 = vcmp.gt.f32.partialorder %v465_v45, 0.0 }
 0x1b4   : > { %1013 = vpow2.f32 %v475_v46  ;;  %v479_v51 = vmul.f32 1.442695, %v473_v47 }
 0x1b5   : > { %1015 = vpow2.f32 %v477_v48  ;;  %v481_v52 = vmul.f32 1.442695, %v474_v50  ;;  %v694_v16 = vpop.f32.mrb[4].mxu0 }
 0x1b6   : > { %1017 = vpow2.f32 %v479_v51  ;;  %v906_v18 = vpop.f32.mrb[5].mxu0 }
 0x1b7   : > { %1019 = vpow2.f32 %v481_v52  ;;  %v697_v20 = vpop.f32.mrb[6].mxu0 }
 0x1b8   : > { %v907_v21 = vpop.f32.mrb[7].mxu0 }
 0x1be   : > { %v1014_v57 = vpop.eup %1013 }
 0x1bf   : > { %v1016_v58 = vpop.eup %1015  ;;  %v844_v59 = vadd.f32 -1.0, %v1014_v57 }
 0x1c0   : > { %v1018_v60 = vpop.eup %1017  ;;  %v845_v61 = vadd.f32 -1.0, %v1016_v58 }
 0x1c1   : > { %v1020_v62 = vpop.eup %1019  ;;  %v846_v63 = vadd.f32 -1.0, %v1018_v60  ;;  %v487_v0 = vsel %vm467_vm14, %v459_v36, %v844_v59 }
 0x1c2   : > { %v488_v2 = vsel %vm468_vm15, %v461_v38, %v845_v61  ;;  %v847_v3 = vadd.f32 -1.0, %v1020_v62  ;;  %v504_v7 = vsel %vm1373_vm0, %v487_v0, 0.0 }
 0x1c3   : > { %v489_v5 = vsel %vm469_vm9, %v463_v42, %v846_v63  ;;  %v505_v10 = vsel %vm503_vm1, %v488_v2, 0.0 }
 0x1c4   : > { %v490_v6 = vsel %vm470_vm8, %v465_v45, %v847_v3  ;;  %v506_v8 = vsel %vm1373_vm0, %v489_v5, 0.0  ;;  %v872_v9 = vpack.c.bf16 %v489_v5, %v487_v0 }
 0x1c5   : > { %v507_v11 = vsel %vm503_vm1, %v490_v6, 0.0  ;;  %v508_v12 = vpack.c.bf16 %v506_v8, %v504_v7 }
 0x1c6   : > { %v509_v13 = vpack.c.bf16 %v507_v11, %v505_v10  ;;  %885 = vmatpush3.bf16.msk.msra.mxu1 %vm871_vm7, %v872_v9 }
 0x1c7   : > { %513 = vrot.lane.b32.xlu1 %v508_v12, %s1161_s17  ;;  %886 = vmatprep.subr.bf16.mxu1 %v1167_v4 }
 0x1c8   : > { %515 = vrot.lane.b32.xlu0 %v509_v13, %s1161_s17  ;;  %s737_s17 = sadd.s32 %s1139_s27, %s860_s22  ;;  %s1434_s27 = scalar_lea.sflag [#allocation6], %s298_s23 }
 0x1cb   : > { %520 = vrot.lane.b32.xlu1 %v508_v12, %s1160_s20 }
 0x1cc   : > { %522 = vrot.lane.b32.xlu0 %v509_v13, %s1160_s20  ;;  %s861_s20 = sshll.u32 %s737_s17, 6 }
 0x1cd   : > { %s1430_s12 = scalar_lea.hbm %s1493_s7, %s861_s20 }
 0x1cf   : > { %527 = vrot.lane.b32.xlu1 %v508_v12, %s1162_s18 }
 0x1d0   : > { %529 = vrot.lane.b32.xlu0 %v509_v13, %s1162_s18  ;;  %s740_s18 = sshll.u32 %s300_s19, 4  ;;  %s1432_s18 = int_to_ptr.vmem [resolvable:$true] %s740_s18 }
 0x1d1   : > { %s1057_s28 = scalar_lea.vmem %s1432_s18, 128 }
 0x1d2   : > { %p1058_p8 = scmp.ne.s32.totalorder %s1432_s18, %s1057_s28 }
 0x1d3   : > { %534 = vrot.lane.b32.xlu1 %v508_v12, %s1163_s10 }
 0x1d4   : > { %536 = vrot.lane.b32.xlu0 %v509_v13, %s1163_s10  ;;  %p1059_p12 = pnand %p1058_p8, %p1515_p10 }
 0x1d6   : > { %p1060_p0 = pneg %p1059_p12 }
 0x1d7   : > { %541 = vrot.lane.b32.xlu1 %v508_v12, %s1164_s9 }
 0x1d8   : > { %543 = vrot.lane.b32.xlu0 %v509_v13, %s1164_s9 }
 0x1db   : > { %548 = vrot.lane.b32.xlu1 %v508_v12, %s1165_s13 }
 0x1dc   : > { %550 = vrot.lane.b32.xlu0 %v509_v13, %s1165_s13  ;;  %s1169_s13 = smov [#allocation7]  }
 0x1dd   : > { %s1061_s14 = sshll.u32 %s1169_s13, 4  ;;  %s1062_s14 = int_to_ptr.vmem [resolvable:$false] %s1061_s14 }
 0x1de   : > { %s1063_s22 = scalar_lea.vmem %s1062_s14, 256  ;;  %p1064_p2 = scmp.lt.s32.totalorder %s1432_s18, %s1062_s14 }
 0x1df   : > { %568 = vperm.xlu1 %1006, %v564_v14   ;;  %p1065_p5 = scmp.lt.s32.totalorder %s1063_s22, %s1057_s28 }
 0x1e0   : > { %573 = vperm.xlu0 %1005, %v565_v15  }
 0x1e1   : > { %p1066_p6 = por %p1065_p5, %p1064_p2 }
 0x1e3   : > { %643 = vperm.xlu1 %1006, %v639_v17   ;;  %p1067_p7 = pnand %p1066_p6, %p1060_p0 }
 0x1e4   : > { %648 = vperm.xlu0 %1005, %v640_v19  }
 0x239   : > { %v514_v22 = vpop.permute.xlu1 %513 }
 0x23a   : > { %v516_v23 = vpop.permute.xlu0 %515 }
 0x23b   : > { %v517_v24 = vsel %vm331_vm3, %v514_v22, %v516_v23  ;;  %vm1514_vm3 = vcmask 916480  }
 0x23c   : > { %887 = vmatpush3.bf16.msra.mxu1 %v517_v24 }
 0x23d   : > { %v521_v25 = vpop.permute.xlu1 %520  ;;  %888 = vmatprep.subr.bf16.mxu1 %v1167_v4 }
 0x23e   : > { %v523_v26 = vpop.permute.xlu0 %522 }
 0x23f   : > { %v524_v27 = vsel %vm341_vm2, %v521_v25, %v523_v26  ;;  %vm1513_vm2 = vcmask 998400  }
 0x240   : > { %889 = vmatpush3.bf16.msra.mxu1 %v524_v27 }
 0x241   : > { %v528_v28 = vpop.permute.xlu1 %527  ;;  %890 = vmatprep.subr.bf16.mxu1 %v1167_v4 }
 0x242   : > { %v530_v29 = vpop.permute.xlu0 %529 }
 0x243   : > { %v531_v30 = vsel %vm351_vm4, %v528_v28, %v530_v29 }
 0x244   : > { %891 = vmatpush3.bf16.msra.mxu1 %v531_v30 }
 0x245   : > { %v535_v31 = vpop.permute.xlu1 %534  ;;  %892 = vmatprep.subr.bf16.mxu1 %v1167_v4 }
 0x246   : > { %v537_v32 = vpop.permute.xlu0 %536 }
 0x247   : > { %v538_v33 = vsel %vm361_vm5, %v535_v31, %v537_v32 }
 0x248   : > { %893 = vmatpush3.bf16.msra.mxu1 %v538_v33 }
 0x249   : > { %v542_v34 = vpop.permute.xlu1 %541  ;;  %894 = vmatprep.subr.bf16.mxu1 %v1167_v4 }
 0x24a   : > { %v544_v35 = vpop.permute.xlu0 %543 }
 0x24b   : > { %v545_v36 = vsel %vm371_vm6, %v542_v34, %v544_v35 }
 0x24c   : > { %895 = vmatpush3.bf16.msra.mxu1 %v545_v36 }
 0x24d   : > { %v549_v37 = vpop.permute.xlu1 %548  ;;  %896 = vmatprep.subr.bf16.mxu1 %v1167_v4 }
 0x24e   : > { %v551_v38 = vpop.permute.xlu0 %550 }
 0x24f   : > { %v552_v39 = vsel %vm1513_vm2, %v549_v37, %v551_v38 }
 0x250   : > { %897 = vmatpush3.bf16.msra.mxu1 %v552_v39 }
 0x253   : > { %899 = vmatmul.mubr.msk.bf16.vlgmr.msra.gmra.mrb[0].mxu1 %vm1514_vm3, %v1012_v40 }
 0x25e   : > { %v569_v41 = vpop.permute.xlu1 %568 }
 0x25f   : > { %v574_v45 = vpop.permute.xlu0 %573 }
 0x262   : > { %v644_v52 = vpop.permute.xlu1 %643 }
 0x263   : > { %v649_v54 = vpop.permute.xlu0 %648  ;;  %v695_v57 = vadd.f32 %v694_v16, %v644_v52 }
 0x264   : > { %v698_v60 = vadd.f32 %v697_v20, %v649_v54 }
 0x326   : > { %v618_v42 = vpop.f32.mrb[0].mxu1 }
 0x327   : > { %v619_v43 = vadd.f32 %v618_v42, %v569_v41  ;;  %v900_v44 = vpop.f32.mrb[1].mxu1 }
 0x328   : > { %v621_v46 = vpop.f32.mrb[2].mxu1 }
 0x329   : > { %v627_v47 = vmin.f32 %v619_v43, 0.0  ;;  %v622_v48 = vadd.f32 %v621_v46, %v574_v45  ;;  %v901_v49 = vpop.f32.mrb[3].mxu1  ;;  %vm625_vm4 = vcmp.gt.f32.partialorder %v619_v43, 0.0 }
 0x32b   : > { %v629_v4 = vmul.f32 1.442695, %v627_v47  ;;  %v628_v50 = vmin.f32 %v622_v48, 0.0  ;;  %vm626_vm5 = vcmp.gt.f32.partialorder %v622_v48, 0.0 }
 0x32d   : > { %1021 = vpow2.f32 %v629_v4  ;;  %v631_v51 = vmul.f32 1.442695, %v628_v50 }
 0x32f   : > { %1023 = vpow2.f32 %v631_v51 }
 0x337   : > { %v1022_v53 = vpop.eup %1021 }
 0x338   : > { %v851_v55 = vadd.f32 -1.0, %v1022_v53 }
 0x339   : > { %v1024_v56 = vpop.eup %1023 }
 0x33a   : > { %v635_v58 = vsel %vm625_vm4, %v619_v43, %v851_v55  ;;  %v852_v59 = vadd.f32 -1.0, %v1024_v56 }
 0x33b   : > { %v701_v61 = vadd.f32 %v695_v57, %v635_v58 }
 0x33c   : > { %v636_v62 = vsel %vm626_vm5, %v622_v48, %v852_v59 }
 0x33d   : > { %v705_v63 = vmin.f32 %v701_v61, 0.0  ;;  %v702_v0 = vadd.f32 %v698_v60, %v636_v62  ;;  %vm703_vm6 = vcmp.gt.f32.partialorder %v701_v61, 0.0 }
 0x33f   : > { %v707_v1 = vmul.f32 1.442695, %v705_v63  ;;  %v706_v2 = vmin.f32 %v702_v0, 0.0  ;;  %vm704_vm7 = vcmp.gt.f32.partialorder %v702_v0, 0.0 }
 0x341   : > { %1025 = vpow2.f32 %v707_v1  ;;  %v709_v3 = vmul.f32 1.442695, %v706_v2 }
 0x343   : > { %1027 = vpow2.f32 %v709_v3 }
 0x34b   : > { %v1026_v5 = vpop.eup %1025 }
 0x34c   : > { %v855_v6 = vadd.f32 -1.0, %v1026_v5 }
 0x34d   : > { %v1028_v7 = vpop.eup %1027 }
 0x34e   : > { %v856_v8 = vadd.f32 -1.0, %v1028_v7  ;;  %v713_v9 = vsel %vm703_vm6, %v701_v61, %v855_v6 }
 0x350   : > { %v714_v10 = vsel %vm704_vm7, %v702_v0, %v856_v8 }
 0x351   : > { %v869_v11 = vpack.c.bf16 %v714_v10, %v713_v9 }
 0x353   : > { %870 = vst [vmem:[%s300_s19] sm:$0xff] %v869_v11  }
 0x354   : > { %1070 = shalt.err (!%p1067_p7)
}
 0x355   : > { %s1071_s23 = scalar_lea.hbm %s1430_s12, 128  ;;  %s1075_s20 = scalar_lea.hbm %s1493_s7, 512 }
 0x356   : > { %p1072_p9 = scmp.ne.s32.totalorder %s1430_s12, %s1071_s23  ;;  %p1076_p1 = scmp.lt.u32.totalorder %s1430_s12, %s1493_s7 }
 0x357   : > { %p1077_p4 = scmp.lt.u32.totalorder %s1075_s20, %s1071_s23  ;;  %p1079_p8 = scmp.lt.u32.totalorder %s1071_s23, %s1430_s12 }
 0x358   : > { %p1073_p11 = pnand %p1072_p9, %p1515_p10 }
 0x359   : > { %p1078_p3 = por %p1077_p4, %p1076_p1 }
 0x35a   : > { %p1074_p13 = pneg %p1073_p11 }
 0x35b   : > { %p1080_p12 = por %p1079_p8, %p1078_p3 }
 0x35d   : > { %p1081_p0 = pnand %p1080_p12, %p1074_p13 }
 0x35f   : > { %1084 = shalt.err (!%p1081_p0)
}
 0x360   : > { %s1170_s9 = smov 64   ;;  %s1171_s28 = smov 128  }
 0x361   : > { %s1172_s13 = smov 4  }
 0x362   : > { %913 = dma.vmem_to_hbm [thread:$0]  (%p1515_p10), %s1432_s18, 128, %s1430_s12, %s1434_s27, %s1170_s9, %s1171_s28, %s1172_s13  }
 0x363 PF: > { %p925_p2 = scmp.ge.s32.totalorder %s1155_s8, 2  ;;  %s755_s14 = sand.u32 1, %s1127_s24  }
 0x364   : > { %p1516_p5 = scmp.ne.s32.totalorder %s1505_s16, 0  ;;  %s756_s22 = scalar_lea.sflag [#allocation6], %s755_s14 }
 0x366   : > { %p920_p6 = pnand %p925_p2, %p1516_p5 }
 0x368   : > { %1122 = dma.done.wait (!%p920_p6), %s756_s22, 128  }
 0x369   : > { %1124 = vsyncadd (!%p920_p6), %s756_s22, 4294967168  ;;  %s21_s8 = sadd.s32 1, %s1155_s8   ;;  %s1517_s15 = sld [smem:[#allocation10_spill]] }
 0x36a   : > { %p18_p7 = scmp.ge.s32.totalorder %s21_s8, 6   ;;  %s1518_s18 = sld [smem:[#allocation11_spill]] }
 0x36b   : > { %s1519_s24 = smov %s1131_s25  ;;  %s1520_s25 = smov %s1135_s26 }
 0x36c   : > { %s1521_s26 = smov %s1292_s21  ;;  %s1522_s27 = smov %s1147_s29 }
 0x36d   : > { %s1523_s28 = smov %s1151_s30  ;;  %20 = sbr.rel (!%p18_p7) target bundleno = 6 (0x6), region = 89 }
 0x36f   : > { %s1524_s29 = smov %s1517_s15 }
 0x370   : > { %s1525_s30 = smov %s1518_s18 }
 0x374   :  { %761 = vsyncpa [#allocation5], 1 }
 0x375   :  { %763 = vsyncpa [#allocation5 + $0x1], 1 }
 0x376   :  { %764 = vsyncpa [#allocation6], 1 }
 0x377   :  { %766 = vsyncpa [#allocation6 + $0x1], 1 }

</bundles_post_ra>
